<compile_context>
chip_gen: v6e
topology: v6e:2x2x1
jax: 0.10.0
libtpu: 0.0.40
codegen_flags: <defaults>
</compile_context>

<pallas_src>
import jax
import jax.numpy as jnp
from jax.experimental import pallas as pl
from jax.experimental.pallas import tpu as pltpu


def _affine_kernel(x_ref, scale_ref, bias_ref, o_ref):
    # x_ref:     (R_TILE, HW_TILE)  input dtype
    # scale_ref: (R_TILE, 1)        float32
    # bias_ref:  (R_TILE, 1)        float32
    x = x_ref[...].astype(jnp.float32)
    s = scale_ref[...]          # broadcasts over the lane axis
    b = bias_ref[...]
    o_ref[...] = (x * s + b).astype(o_ref.dtype)


def _sublane_align(dtype):
    # f32 -> 8, bf16 -> 16, int8/fp8 -> 32 (packed sublanes).
    itemsize = jnp.dtype(dtype).itemsize
    return max(8, 32 // max(itemsize, 1))


def _pick_tile(dim, target, align):
    """Largest tile <= target that is a multiple of `align`, or the full dim
    when the dim already fits (full-dim blocks are always layout-legal)."""
    if dim <= target:
        return dim
    return max((target // align) * align, align)


def affine(x, scale=None, bias=None, *, row_tile_target=256, lane_tile_target=2048):
    """y[n, c, ...] = x[n, c, ...] * scale[c] + bias[c]   (channel dim = 1).

    x: (N, C, *spatial). scale/bias: (C,) float-like or None (treated as
    1 / 0, matching the PyTorch module when that parameter is disabled).
    """
    orig_shape = x.shape
    assert x.ndim >= 2, "expected at least (N, C)"
    N, C = orig_shape[0], orig_shape[1]
    HW = 1
    for d in orig_shape[2:]:
        HW *= d
    R = N * C
    dtype = x.dtype

    if scale is None:
        scale = jnp.ones((C,), jnp.float32)
    if bias is None:
        bias = jnp.zeros((C,), jnp.float32)

    # 2D slab: rows = (n, c), lanes = flattened spatial.
    x2 = x.reshape(R, HW)
    # Per-row params in f32 (row index r = n*C + c  ->  param index r % C).
    scale2 = jnp.tile(scale.astype(jnp.float32), N).reshape(R, 1)
    bias2 = jnp.tile(bias.astype(jnp.float32), N).reshape(R, 1)

    # Tile selection: lane tile is a multiple of 128 (or the full HW); row
    # tile is a multiple of the dtype's sublane pack (or the full R).
    row_tile = _pick_tile(R, row_tile_target, _sublane_align(dtype))
    lane_tile = _pick_tile(HW, lane_tile_target, 128)

    grid = (pl.cdiv(R, row_tile), pl.cdiv(HW, lane_tile))

    out = pl.pallas_call(
        _affine_kernel,
        out_shape=jax.ShapeDtypeStruct((R, HW), dtype),
        grid_spec=pltpu.PrefetchScalarGridSpec(
            num_scalar_prefetch=0,
            grid=grid,
            in_specs=[
                pl.BlockSpec((row_tile, lane_tile), lambda r, c: (r, c)),
                pl.BlockSpec((row_tile, 1), lambda r, c: (r, 0)),
                pl.BlockSpec((row_tile, 1), lambda r, c: (r, 0)),
            ],
            out_specs=pl.BlockSpec((row_tile, lane_tile), lambda r, c: (r, c)),
        ),
        compiler_params=pltpu.CompilerParams(
            dimension_semantics=("parallel", "parallel"),
        ),
    )(x2, scale2, bias2)

    return out.reshape(orig_shape)


if __name__ == "__main__":
    key = jax.random.PRNGKey(0)
    N, C, H, W = 2, 4, 16, 16
    scale_init = 1.0

    kx, ks, kb = jax.random.split(key, 3)
    x = jax.random.normal(kx, (N, C, H, W), dtype=jnp.float32)

    # Deterministic parameter init matching Affine.__init__:
    #   scale = ones(C) * scale_init, bias = zeros(C)
    # (perturbed slightly so the test is non-trivial but still deterministic)
    scale = jnp.ones((C,), jnp.float32) * scale_init + 0.1 * jax.random.normal(
        ks, (C,), dtype=jnp.float32
    )
    bias = jnp.zeros((C,), jnp.float32) + 0.1 * jax.random.normal(
        kb, (C,), dtype=jnp.float32
    )

    y = affine(x, scale, bias)
    y = jax.block_until_ready(y)

    # Reference check against plain-JAX broadcast semantics (NCHW).
    y_ref = x * scale[None, :, None, None] + bias[None, :, None, None]
    assert y.shape == (N, C, H, W)
    assert jnp.allclose(y, y_ref, atol=1e-6, rtol=1e-6)

    # Also exercise the "no bias" / "no scale" paths of the module.
    y_ns = affine(x, None, bias)
    y_nb = affine(x, scale, None)
    assert jnp.allclose(y_ns, x + bias[None, :, None, None], atol=1e-6, rtol=1e-6)
    assert jnp.allclose(y_nb, x * scale[None, :, None, None], atol=1e-6, rtol=1e-6)

    print("KERNEL_OK")
</pallas_src>

<mosaic_0001>
module attributes {stable_mosaic.version = 11 : i64} {
  func.func @_affine_kernel(%arg0: i32, %arg1: i32, %arg2: memref<8x256xf32, #tpu.memory_space<vmem>>, %arg3: memref<8x1xf32, #tpu.memory_space<vmem>>, %arg4: memref<8x1xf32, #tpu.memory_space<vmem>>, %arg5: memref<8x256xf32, #tpu.memory_space<vmem>>) attributes {dimension_semantics = [#tpu.dimension_semantics<parallel>, #tpu.dimension_semantics<parallel>], iteration_bounds = array<i64: 1, 1>, scalar_prefetch = 0 : i64, scratch_operands = 0 : i64, tpu.core_type = #tpu.core_type<tc>, window_params = [{transform_indices = @transform_0, window_bounds = array<i64: 8, 256>}, {transform_indices = @transform_1, window_bounds = array<i64: 8, 1>}, {transform_indices = @transform_2, window_bounds = array<i64: 8, 1>}, {transform_indices = @transform_3, window_bounds = array<i64: 8, 256>}]} {
    %c0 = arith.constant 0 : index
    %c0_0 = arith.constant 0 : index
    %0 = vector.load %arg2[%c0, %c0_0] : memref<8x256xf32, #tpu.memory_space<vmem>>, vector<8x256xf32>
    %c0_1 = arith.constant 0 : index
    %c0_2 = arith.constant 0 : index
    %1 = vector.load %arg3[%c0_1, %c0_2] : memref<8x1xf32, #tpu.memory_space<vmem>>, vector<8x1xf32>
    %c0_3 = arith.constant 0 : index
    %c0_4 = arith.constant 0 : index
    %2 = vector.load %arg4[%c0_3, %c0_4] : memref<8x1xf32, #tpu.memory_space<vmem>>, vector<8x1xf32>
    %3 = vector.broadcast %1 : vector<8x1xf32> to vector<8x256xf32>
    %4 = arith.mulf %0, %3 : vector<8x256xf32>
    %5 = vector.broadcast %2 : vector<8x1xf32> to vector<8x256xf32>
    %6 = arith.addf %4, %5 : vector<8x256xf32>
    %c0_5 = arith.constant 0 : index
    %c0_6 = arith.constant 0 : index
    %7 = vector.load %arg5[%c0_5, %c0_6] : memref<8x256xf32, #tpu.memory_space<vmem>>, vector<8x256xf32>
    tpu.vector_store %arg5[%c0_5, %c0_6], %6 {strides = array<i32>} : memref<8x256xf32, #tpu.memory_space<vmem>>, vector<8x256xf32>,
    return
  }
  func.func @transform_0(%arg0: i32, %arg1: i32) -> (i32, i32) {
    %c0_i32 = arith.constant 0 : i32
    return %arg0, %arg1 : i32, i32
  }
  func.func @transform_1(%arg0: i32, %arg1: i32) -> (i32, i32) {
    %c0_i32 = arith.constant 0 : i32
    %c0_i32_0 = arith.constant 0 : i32
    return %arg0, %c0_i32 : i32, i32
  }
  func.func @transform_2(%arg0: i32, %arg1: i32) -> (i32, i32) {
    %c0_i32 = arith.constant 0 : i32
    %c0_i32_0 = arith.constant 0 : i32
    return %arg0, %c0_i32 : i32, i32
  }
  func.func @transform_3(%arg0: i32, %arg1: i32) -> (i32, i32) {
    %c0_i32 = arith.constant 0 : i32
    return %arg0, %arg1 : i32, i32
  }
}

</mosaic_0001>

<bundles_post_ra>
// kernel: tpu_custom_call.1
= control target key start
LH: loop header
LB: loop body
LE: loop exit
PB: predicated region body
PF: predicated region fallthrough
CT: control target
= control target key end

     0   :  { %v74_v1 = vmov 0   ;;  %s111_s0 = inlined_call_operand.vmem [shape: f32[8,256], index: 0, kind: input, shape index: {}]   ;;  %s112_s1 = inlined_call_operand.vmem [shape: f32[8,1], index: 1, kind: input, shape index: {}]   ;;  %s113_s2 = inlined_call_operand.vmem [shape: f32[8,1], index: 2, kind: input, shape index: {}]   ;;  %s114_s3 = inlined_call_operand.hbm [shape: f32[8,256], index: 3, kind: output, shape index: {}]  }
   0x1   :  { %v17_v0 = vld [vmem:[%s112_s1] sm:$0xff]  ;;  %51 = vset.pattern.permute.xlu0 %v74_v1 }
   0x2   :  { %8 = vsyncpa [#allocation3], 0  ;;  %21 = vperm.xlu0 %51, %v17_v0   ;;  %v18_v2 = vld [vmem:[%s113_s2] sm:$0xff]  ;;  %v16_v5 = vld [vmem:[%s111_s0 + $0x8] sm:$0xff]  ;;  %s75_s20 = smov [#allocation2]  }
   0x3   :  { %v15_v4 = vld [vmem:[%s111_s0] sm:$0xff]  ;;  %s41_s1 = sshll.u32 %s75_s20, 4  ;;  %s42_s1 = int_to_ptr.vmem [resolvable:$true] %s41_s1 }
   0x4   :  { %s52_s2 = scalar_lea.vmem %s42_s1, 256  ;;  %p57_p1 = scmp.lt.s32.totalorder %s42_s1, %s42_s1 }
   0x5   :  { %p53_p0 = scmp.ne.s32.totalorder %s42_s1, %s52_s2  ;;  %p58_p2 = scmp.lt.s32.totalorder %s52_s2, %s52_s2 }
   0x6   :  { %28 = vperm.xlu0 %51, %v18_v2  }
   0x7   :  { %p59_p3 = por %p58_p2, %p57_p1 }
   0x9   :  { %p60_p4 = pnand %p59_p3, %p53_p0 }
  0x7d   :  { %v22_v3 = vpop.permute.xlu0 %21 }
  0x7e   :  { %v24_v6 = vmul.f32 %v22_v3, %v15_v4  ;;  %v25_v7 = vmul.f32 %v22_v3, %v16_v5 }
  0x81   :  { %v29_v8 = vpop.permute.xlu0 %28 }
  0x82   :  { %v31_v9 = vadd.f32 %v29_v8, %v24_v6  ;;  %v32_v10 = vadd.f32 %v29_v8, %v25_v7 }
  0x84   :  { %33 = vst [vmem:[#allocation2] sm:$0xff] %v31_v9  ;;  %34 = vst [vmem:[#allocation2 + $0x8] sm:$0xff] %v32_v10 }
  0x85   :  { %63 = shalt.err (!%p60_p4)
}
  0x86   :  { %44 = dma.vmem_to_hbm [thread:$0]  %s42_s1, 256, %s114_s3, [#allocation3]  }
  0x87   :  { %72 = dma.done.wait [#allocation3], 256  }
  0x88   :  { %73 = vsyncadd [#allocation3], 4294967040 }
  0x89   :  { %48 = vsyncpa [#allocation3], 1 }

</bundles_post_ra>
